<compile_context>
chip_gen: v7x
topology: tpu7x:2x2x1
jax: 0.10.0
libtpu: 0.0.40
codegen_flags: <defaults>
</compile_context>

<pallas_src>
import functools

import jax
import jax.numpy as jnp
from jax.experimental import pallas as pl
from jax.experimental.pallas import tpu as pltpu

FEAT_DIM = 16   # stand-in for the VGG16 feature width
HIDDEN = 8      # hidden_units default in GazeModel
OUT = 3         # output_features (3-D gaze direction)
LANE = 128      # TPU lane width: hot last dims are padded to this
K_PAD = 32      # padded im2col depth (3*3*C = 27 -> 32; full-last-dim block)


# ---------------------------------------------------------------------------
# Kernel 1: stand-in feature extractor (conv -> ReLU -> global average pool)
# ---------------------------------------------------------------------------
def _feature_kernel(inv_hw, p_ref, fw_ref, fb_ref, feats_ref, acc_ref):
    """One (image-group, HW-tile) grid step.

    p_ref:     [1, B, T, K_PAD] bf16 im2col patch tile of the current group
    fw_ref:    [K_PAD, LANE]    bf16 conv weights (valid [27, FEAT_DIM])
    fb_ref:    [1, LANE]        f32  conv bias    (valid [:, :FEAT_DIM])
    feats_ref: [1, B, LANE]     f32  pooled features for the current group
    acc_ref:   [B, LANE]        f32  VMEM running pixel-sum over HW tiles
    """
    t = pl.program_id(1)

    @pl.when(t == 0)
    def _init():
        acc_ref[...] = jnp.zeros_like(acc_ref)

    p = p_ref[0]                                           # [B, T, K]
    b, tile, k = p.shape
    # conv-as-matmul: bf16 operands, f32 accumulation on the MXU.
    y = jnp.dot(p.reshape(b * tile, k), fw_ref[...],
                preferred_element_type=jnp.float32)        # [B*T, LANE]
    y = jnp.maximum(y + fb_ref[...], 0.0)
    # per-image partial pixel sums for this tile
    acc_ref[...] += jnp.sum(y.reshape(b, tile, -1), axis=1)

    @pl.when(t == pl.num_programs(1) - 1)
    def _finalize():
        feats_ref[0] = acc_ref[...] * inv_hw               # one unmasked store


# ---------------------------------------------------------------------------
# Kernel 2: MLP head (cat -> lin1 -> ReLU -> lin2), all 128-lane padded
# ---------------------------------------------------------------------------
def _head_kernel(feats_ref, ex_ref, w1_ref, b1_ref, w2_ref, b2_ref, out_ref):
    """feats_ref: [2, B, LANE] f32  pooled face / eye features
    ex_ref:    [B, LANE]      f32  extras = [head_rot(9)|origin(3)|pref(P)], zero-padded
    w1_ref:    [3*LANE, LANE] f32  lin1 weights (face | eye | extras row blocks)
    b1_ref:    [1, LANE]      f32  lin1 bias   (valid [:, :HIDDEN])
    w2_ref:    [LANE, LANE]   f32  lin2 weights (valid [HIDDEN, OUT])
    b2_ref:    [1, LANE]      f32  lin2 bias   (valid [:, :OUT])
    out_ref:   [B, LANE]      f32  padded y3   (valid [:, :OUT])
    """
    # torch.cat((face, eye, extras), axis=1): lane-concat of 128-wide blocks,
    # so lin1 is a single MXU contraction instead of 3 matmuls + 2 adds.
    x = jnp.concatenate([feats_ref[0], feats_ref[1], ex_ref[...]], axis=-1)
    y1 = jnp.dot(x, w1_ref[...], preferred_element_type=jnp.float32) + b1_ref[...]
    y2 = jnp.maximum(y1, 0.0)
    out_ref[...] = (jnp.dot(y2, w2_ref[...], preferred_element_type=jnp.float32)
                    + b2_ref[...])


# ---------------------------------------------------------------------------
# Glue
# ---------------------------------------------------------------------------
def _im2col_3x3_same(x):
    """x: [N, H, W, C] -> patches [N, H*W, 9*C] ('same' padding, taps outer)."""
    n, h, w, c = x.shape
    xp = jnp.pad(x, ((0, 0), (1, 1), (1, 1), (0, 0)))
    cols = [xp[:, di:di + h, dj:dj + w, :] for di in range(3) for dj in range(3)]
    return jnp.concatenate(cols, axis=-1).reshape(n, h * w, 9 * c)


def prepare_params(params, pref_dim=None):
    """One-time conversion of PyTorch-layout params into kernel-ready slabs:
    pre-transposed, zero-padded to 128 lanes, conv weights cast to bf16."""
    f32 = jnp.float32

    def pad2d(block, rows, cols=LANE):
        out = jnp.zeros((rows, cols), f32)
        return out.at[:block.shape[0], :block.shape[1]].set(block.astype(f32))

    w1t = params["w1"].T                      # [input_features, HIDDEN]
    hid = w1t.shape[1]
    extras_dim = w1t.shape[0] - 2 * FEAT_DIM  # head_rot(9)+origin(3)+pref(P)
    assert 0 < extras_dim <= LANE, (
        f"lin1 has {w1t.shape[0]} input features; implied extras width "
        f"{extras_dim} must be in (0, {LANE}]")
    assert hid <= LANE
    if pref_dim is not None:
        assert extras_dim == 9 + 3 + pref_dim, (
            f"lin1 expects extras width {extras_dim}, got "
            f"head_rot(9)+origin(3)+pref({pref_dim}) = {9 + 3 + pref_dim}")

    # lin1 weights as ONE [3*LANE, LANE] slab: rows [0,128)=face features,
    # [128,256)=eye features, [256,384)=extras.  Unused rows stay zero so the
    # zero-padded lanes of the activations contribute nothing.
    w1_slab = jnp.zeros((3 * LANE, LANE), f32)
    w1_slab = w1_slab.at[:FEAT_DIM, :hid].set(w1t[:FEAT_DIM].astype(f32))
    w1_slab = w1_slab.at[LANE:LANE + FEAT_DIM, :hid].set(
        w1t[FEAT_DIM:2 * FEAT_DIM].astype(f32))
    w1_slab = w1_slab.at[2 * LANE:2 * LANE + extras_dim, :hid].set(
        w1t[2 * FEAT_DIM:].astype(f32))

    return {
        "fw": pad2d(params["fw"], K_PAD).astype(jnp.bfloat16),
        "fb": pad2d(params["fb"], 1),
        "w1": w1_slab,
        "b1": pad2d(params["b1"], 1),
        "w2": pad2d(params["w2"].T, LANE),
        "b2": pad2d(params["b2"], 1),
        "extras_dim": extras_dim,             # checked (outside jit) per call
    }


def _pick_tile_hw(hw, batch, k_pad, patch_budget_bytes=4 << 20):
    """Largest multiple-of-8 divisor of hw whose double-buffered bf16 patch
    tile stays within the budget (conservative enough for v7x's 32 MiB scoped
    VMEM default; v5e/v6e have headroom to spare)."""
    bytes_per_row = batch * k_pad * 2               # bf16
    max_rows = max(8, patch_budget_bytes // (2 * bytes_per_row))
    if hw <= max_rows:
        return hw
    best = None
    for cand in range(8, int(min(hw, max_rows)) + 1, 8):
        if hw % cand == 0:
            best = cand
    return best if best is not None else hw         # fall back: single tile


def _vmem_limit_bytes(batch, tile_hw, k_pad):
    patch = batch * tile_hw * k_pad * 2                      # bf16 patch tile
    fixed = (k_pad * LANE * 2 + LANE * 4                     # conv weights/bias
             + 2 * 2 * batch * LANE * 4 + batch * LANE * 4)  # feats out + acc
    need = 2 * patch + fixed                                 # double-buffered
    return int(min(32 << 20, max(16 << 20, 2 * need)))


@functools.partial(jax.jit, static_argnames=("store_queries", "tile_hw"))
def _gaze_forward_impl(kparams, inputs, pref_vector, store_queries, tile_hw):
    face_img, eye_img = inputs["face"], inputs["eye"]
    batch, h, w, _ = face_img.shape
    hw = h * w

    # im2col per image (raw face/eye images are never concatenated in HBM);
    # K is padded only to 32 lanes (full-last-dim block, so the (8,128) rule
    # still holds) and cast to bf16 for the MXU.  The stack is fused by XLA
    # into the producer that writes the patch slab — no extra HBM pass.
    fp = _im2col_3x3_same(face_img)                           # [B, HW, 9C]
    ep = _im2col_3x3_same(eye_img)
    k = fp.shape[-1]
    assert k <= K_PAD
    patches = jnp.stack([fp, ep], axis=0)                     # [2, B, HW, 9C]
    patches = jnp.pad(patches, ((0, 0), (0, 0), (0, 0), (0, K_PAD - k)))
    patches = patches.astype(jnp.bfloat16)                    # [2, B, HW, 32]
    # TODO(synk): for VGG-sized images, do the im2col in-kernel from raw NHWC
    # row blocks (1-row halo) to cut the remaining ~10x patch-stream inflation.

    if tile_hw is None:
        tile_hw = _pick_tile_hw(hw, batch, K_PAD)
    assert hw % tile_hw == 0, f"tile_hw={tile_hw} must divide HW={hw}"
    n_tiles = hw // tile_hw

    feats = pl.pallas_call(
        functools.partial(_feature_kernel, 1.0 / hw),
        out_shape=jax.ShapeDtypeStruct((2, batch, LANE), jnp.float32),
        grid_spec=pltpu.PrefetchScalarGridSpec(
            num_scalar_prefetch=0,
            grid=(2, n_tiles),                 # (image group, HW row tiles)
            in_specs=[
                pl.BlockSpec((1, batch, tile_hw, K_PAD),
                             lambda g, t: (g, 0, t, 0)),
                pl.BlockSpec((K_PAD, LANE), lambda g, t: (0, 0)),
                pl.BlockSpec((1, LANE), lambda g, t: (0, 0)),
            ],
            out_specs=pl.BlockSpec((1, batch, LANE), lambda g, t: (g, 0, 0)),
            scratch_shapes=[pltpu.VMEM((batch, LANE), jnp.float32)],
        ),
        compiler_params=pltpu.CompilerParams(
            # group axis is parallel: on v7x the face/eye halves land on the
            # two TensorCores; on v5e/v6e it is just a sequential outer loop.
            dimension_semantics=("parallel", "arbitrary"),
            vmem_limit_bytes=_vmem_limit_bytes(batch, tile_hw, K_PAD),
        ),
    )(patches, kparams["fw"], kparams["fb"])

    extras = jnp.concatenate(
        [inputs["head_rot_mat"], inputs["origin"], pref_vector], axis=1)
    assert extras.shape[1] <= LANE
    extras_pad = jnp.pad(extras, ((0, 0), (0, LANE - extras.shape[1])))

    y3_pad = pl.pallas_call(
        _head_kernel,
        out_shape=jax.ShapeDtypeStruct((batch, LANE), jnp.float32),
        in_specs=[pl.BlockSpec(memory_space=pltpu.MemorySpace.VMEM)] * 6,
        out_specs=pl.BlockSpec(memory_space=pltpu.MemorySpace.VMEM),
        compiler_params=pltpu.CompilerParams(vmem_limit_bytes=16 << 20),
    )(feats, extras_pad, kparams["w1"], kparams["b1"], kparams["w2"],
      kparams["b2"])

    y3 = y3_pad[:, :OUT]
    if store_queries:
        # TODO(synk): PyTorch mutates self.queries / self.pref_vecs (Python-
        # side state); the query / pref_vector are returned here instead.
        query = jnp.concatenate(
            [feats[0, :, :FEAT_DIM], feats[1, :, :FEAT_DIM],
             inputs["head_rot_mat"], inputs["origin"], inputs["gaze"]], axis=1)
        return y3, query, pref_vector
    return y3


def gaze_model_forward(kparams, inputs, pref_vector, store_queries=False,
                       tile_hw=None):
    """Public entry: static shape checks outside jit, then the jitted impl."""
    extras_dim = (inputs["head_rot_mat"].shape[1] + inputs["origin"].shape[1]
                  + pref_vector.shape[1])
    if extras_dim != kparams["extras_dim"]:
        raise ValueError(
            f"lin1 was prepared for extras width {kparams['extras_dim']}, got "
            f"head_rot+origin+pref = {extras_dim}")
    arrays = {name: v for name, v in kparams.items() if name != "extras_dim"}
    return _gaze_forward_impl(arrays, inputs, pref_vector,
                              store_queries=store_queries, tile_hw=tile_hw)


# ---------------------------------------------------------------------------
# Pure-JAX reference for sanity checks
# ---------------------------------------------------------------------------
def _reference_forward(params, inputs, pref_vector, quantize_like_kernel):
    fw = params["fw"]
    if quantize_like_kernel:
        fw = fw.astype(jnp.bfloat16).astype(jnp.float32)

    def feat(img):
        p = _im2col_3x3_same(img)
        if quantize_like_kernel:
            p = p.astype(jnp.bfloat16).astype(jnp.float32)
        y = jnp.maximum(jnp.einsum("bpk,kf->bpf", p, fw) + params["fb"], 0.0)
        return jnp.mean(y, axis=1)

    face, eye = feat(inputs["face"]), feat(inputs["eye"])
    x = jnp.concatenate(
        [face, eye, inputs["head_rot_mat"], inputs["origin"], pref_vector],
        axis=1)
    y1 = jnp.maximum(x @ params["w1"].T + params["b1"], 0.0)
    return y1 @ params["w2"].T + params["b2"]


# ---------------------------------------------------------------------------
# Main
# ---------------------------------------------------------------------------
if __name__ == "__main__":
    key = jax.random.PRNGKey(0)
    ks = jax.random.split(key, 12)

    B, H, W, C = 2, 16, 16, 3
    PREF = 4
    input_features = 2 * FEAT_DIM + 9 + 3 + PREF  # 48

    inputs = {
        "face": jax.random.normal(ks[0], (B, H, W, C), jnp.float32),
        "eye": jax.random.normal(ks[1], (B, H, W, C), jnp.float32),
        "head_rot_mat": jax.random.normal(ks[2], (B, 9), jnp.float32),
        "origin": jax.random.normal(ks[3], (B, 3), jnp.float32),
        "gaze": jax.random.normal(ks[4], (B, 3), jnp.float32),
    }
    pref_vector = jax.random.normal(ks[5], (B, PREF), jnp.float32)

    params = {
        # stand-in feature extractor (3x3 conv, C -> FEAT_DIM)
        "fw": 0.05 * jax.random.normal(ks[6], (9 * C, FEAT_DIM), jnp.float32),
        "fb": 0.05 * jax.random.normal(ks[7], (1, FEAT_DIM), jnp.float32),
        # lin1 / lin2 in PyTorch layout [out_features, in_features]
        "w1": 0.1 * jax.random.normal(ks[8], (HIDDEN, input_features), jnp.float32),
        "b1": 0.1 * jax.random.normal(ks[9], (1, HIDDEN), jnp.float32),
        "w2": 0.1 * jax.random.normal(ks[10], (OUT, HIDDEN), jnp.float32),
        "b2": 0.1 * jax.random.normal(ks[11], (1, OUT), jnp.float32),
    }

    kparams = prepare_params(params, pref_dim=PREF)  # transpose / pad / bf16

    # tile_hw=64 -> 4 HW tiles per image group: exercises the grid's
    # init / accumulate / finalize path even at this toy image size.
    out = gaze_model_forward(kparams, inputs, pref_vector, tile_hw=64)
    jax.block_until_ready(out)
    assert out.shape == (B, OUT)

    # store_queries path (queries are returned instead of mutating module state)
    out_q, query, prefs = gaze_model_forward(
        kparams, inputs, pref_vector, store_queries=True, tile_hw=64)
    jax.block_until_ready(out_q)
    assert query.shape == (B, 2 * FEAT_DIM + 9 + 3 + 3)
    assert prefs.shape == (B, PREF)
    assert jnp.allclose(out_q, out, atol=1e-6, rtol=1e-6)

    # bf16-matched reference: tight tolerance (kernel accumulates in f32)
    ref_bf16 = _reference_forward(params, inputs, pref_vector, True)
    assert jnp.allclose(out, ref_bf16, atol=5e-3, rtol=5e-3), (
        f"max abs diff vs bf16-matched ref: {jnp.max(jnp.abs(out - ref_bf16))}")

    # pure-f32 reference: loose tolerance documents the bf16 patch/weight cast
    ref_f32 = _reference_forward(params, inputs, pref_vector, False)
    assert jnp.allclose(out, ref_f32, atol=2e-2, rtol=2e-2), (
        f"max abs diff vs f32 ref: {jnp.max(jnp.abs(out - ref_f32))}")

    print("KERNEL_OK")
</pallas_src>

<mosaic_0001>
module attributes {stable_mosaic.version = 11 : i64} {
  func.func @_feature_kernel(%arg0: i32, %arg1: i32, %arg2: memref<1x2x64x32xbf16, #tpu.memory_space<vmem>>, %arg3: memref<32x128xbf16, #tpu.memory_space<vmem>>, %arg4: memref<1x128xf32, #tpu.memory_space<vmem>>, %arg5: memref<1x2x128xf32, #tpu.memory_space<vmem>>, %arg6: memref<2x128xf32, #tpu.memory_space<vmem>>) attributes {dimension_semantics = [#tpu.dimension_semantics<parallel>, #tpu.dimension_semantics<arbitrary>], iteration_bounds = array<i64: 2, 4>, scalar_prefetch = 0 : i64, scratch_operands = 1 : i64, tpu.core_type = #tpu.core_type<tc>, window_params = [{transform_indices = @transform_0, window_bounds = array<i64: 1, 2, 64, 32>}, {pipeline_mode = #tpu.pipeline_mode<synchronous>, transform_indices = @transform_1, window_bounds = array<i64: 32, 128>}, {pipeline_mode = #tpu.pipeline_mode<synchronous>, transform_indices = @transform_2, window_bounds = array<i64: 1, 128>}, {transform_indices = @transform_3, window_bounds = array<i64: 1, 2, 128>}]} {
    %c0_i32 = arith.constant 0 : i32
    %0 = arith.cmpi eq, %arg1, %c0_i32 : i32
    %1 = arith.extui %0 : i1 to i32
    %c0_i32_0 = arith.constant 0 : i32
    %2 = arith.cmpi ne, %1, %c0_i32_0 : i32
    scf.if %2 {
      %cst_15 = arith.constant 0.000000e+00 : f32
      %21 = vector.broadcast %cst_15 : f32 to vector<2x128xf32>
      %c0_16 = arith.constant 0 : index
      %c0_17 = arith.constant 0 : index
      %22 = vector.load %arg6[%c0_16, %c0_17] : memref<2x128xf32, #tpu.memory_space<vmem>>, vector<2x128xf32>
      tpu.vector_store %arg6[%c0_16, %c0_17], %21 {strides = array<i32>} : memref<2x128xf32, #tpu.memory_space<vmem>>, vector<2x128xf32>,
    } else {
    }
    %c0 = arith.constant 0 : index
    %c0_1 = arith.constant 0 : index
    %c0_2 = arith.constant 0 : index
    %c0_3 = arith.constant 0 : index
    %3 = vector.load %arg2[%c0, %c0_1, %c0_2, %c0_3] : memref<1x2x64x32xbf16, #tpu.memory_space<vmem>>, vector<1x2x64x32xbf16>
    %4 = vector.shape_cast %3 : vector<1x2x64x32xbf16> to vector<2x64x32xbf16>
    %5 = vector.shape_cast %4 : vector<2x64x32xbf16> to vector<128x32xbf16>
    %c0_4 = arith.constant 0 : index
    %c0_5 = arith.constant 0 : index
    %6 = vector.load %arg3[%c0_4, %c0_5] : memref<32x128xbf16, #tpu.memory_space<vmem>>, vector<32x128xbf16>
    %cst = arith.constant dense<0.000000e+00> : vector<128x128xf32>
    %7 = tpu.matmul %5, %6, %cst {dimension_numbers = #tpu.dot_dimension_numbers<[1], [0], [0], [1], [0, 0, 1, 1], [], []>} : vector<128x32xbf16>, vector<32x128xbf16>, vector<128x128xf32> -> vector<128x128xf32>
    %c0_6 = arith.constant 0 : index
    %c0_7 = arith.constant 0 : index
    %8 = vector.load %arg4[%c0_6, %c0_7] : memref<1x128xf32, #tpu.memory_space<vmem>>, vector<1x128xf32>
    %9 = vector.broadcast %8 : vector<1x128xf32> to vector<128x128xf32>
    %10 = arith.addf %7, %9 : vector<128x128xf32>
    %cst_8 = arith.constant 0.000000e+00 : f32
    %11 = vector.broadcast %cst_8 : f32 to vector<128x128xf32>
    %12 = arith.maximumf %10, %11 : vector<128x128xf32>
    %c0_9 = arith.constant 0 : index
    %c0_10 = arith.constant 0 : index
    %13 = vector.load %arg6[%c0_9, %c0_10] : memref<2x128xf32, #tpu.memory_space<vmem>>, vector<2x128xf32>
    %14 = vector.shape_cast %12 : vector<128x128xf32> to vector<2x64x128xf32>
    %cst_11 = arith.constant dense<0.000000e+00> : vector<2x128xf32>
    %15 = vector.multi_reduction <add>, %14, %cst_11 [1] : vector<2x64x128xf32> to vector<2x128xf32>
    %16 = arith.addf %13, %15 : vector<2x128xf32>
    %c0_12 = arith.constant 0 : index
    %c0_13 = arith.constant 0 : index
    %17 = vector.load %arg6[%c0_12, %c0_13] : memref<2x128xf32, #tpu.memory_space<vmem>>, vector<2x128xf32>
    tpu.vector_store %arg6[%c0_12, %c0_13], %16 {strides = array<i32>} : memref<2x128xf32, #tpu.memory_space<vmem>>, vector<2x128xf32>,
    %c3_i32 = arith.constant 3 : i32
    %18 = arith.cmpi eq, %arg1, %c3_i32 : i32
    %19 = arith.extui %18 : i1 to i32
    %c0_i32_14 = arith.constant 0 : i32
    %20 = arith.cmpi ne, %19, %c0_i32_14 : i32
    scf.if %20 {
      %c0_15 = arith.constant 0 : index
      %c0_16 = arith.constant 0 : index
      %21 = vector.load %arg6[%c0_15, %c0_16] : memref<2x128xf32, #tpu.memory_space<vmem>>, vector<2x128xf32>
      %cst_17 = arith.constant 3.906250e-03 : f32
      %22 = vector.broadcast %cst_17 : f32 to vector<2x128xf32>
      %23 = arith.mulf %21, %22 : vector<2x128xf32>
      %c0_18 = arith.constant 0 : index
      %c0_19 = arith.constant 0 : index
      %c0_20 = arith.constant 0 : index
      %24 = vector.load %arg5[%c0_18, %c0_19, %c0_20] : memref<1x2x128xf32, #tpu.memory_space<vmem>>, vector<1x2x128xf32>
      %25 = vector.shape_cast %24 : vector<1x2x128xf32> to vector<2x128xf32>
      %26 = vector.shape_cast %23 : vector<2x128xf32> to vector<1x2x128xf32>
      tpu.vector_store %arg5[%c0_18, %c0_19, %c0_20], %26 {strides = array<i32>} : memref<1x2x128xf32, #tpu.memory_space<vmem>>, vector<1x2x128xf32>,
    } else {
    }
    return
  }
  func.func @transform_0(%arg0: i32, %arg1: i32) -> (i32, i32, i32, i32) {
    %c0_i32 = arith.constant 0 : i32
    %c0_i32_0 = arith.constant 0 : i32
    %c0_i32_1 = arith.constant 0 : i32
    return %arg0, %c0_i32, %arg1, %c0_i32_0 : i32, i32, i32, i32
  }
  func.func @transform_1(%arg0: i32, %arg1: i32) -> (i32, i32) {
    %c0_i32 = arith.constant 0 : i32
    %c0_i32_0 = arith.constant 0 : i32
    %c0_i32_1 = arith.constant 0 : i32
    return %c0_i32, %c0_i32_0 : i32, i32
  }
  func.func @transform_2(%arg0: i32, %arg1: i32) -> (i32, i32) {
    %c0_i32 = arith.constant 0 : i32
    %c0_i32_0 = arith.constant 0 : i32
    %c0_i32_1 = arith.constant 0 : i32
    return %c0_i32, %c0_i32_0 : i32, i32
  }
  func.func @transform_3(%arg0: i32, %arg1: i32) -> (i32, i32, i32) {
    %c0_i32 = arith.constant 0 : i32
    %c0_i32_0 = arith.constant 0 : i32
    %c0_i32_1 = arith.constant 0 : i32
    return %arg0, %c0_i32, %c0_i32_0 : i32, i32, i32
  }
}

module attributes {stable_mosaic.version = 11 : i64} {
  func.func @_head_kernel(%arg0: memref<2x2x128xf32, #tpu.memory_space<vmem>>, %arg1: memref<2x128xf32, #tpu.memory_space<vmem>>, %arg2: memref<384x128xf32, #tpu.memory_space<vmem>>, %arg3: memref<1x128xf32, #tpu.memory_space<vmem>>, %arg4: memref<128x128xf32, #tpu.memory_space<vmem>>, %arg5: memref<1x128xf32, #tpu.memory_space<vmem>>, %arg6: memref<2x128xf32, #tpu.memory_space<vmem>>) attributes {dimension_semantics = [], scalar_prefetch = 0 : i64, scratch_operands = 0 : i64, tpu.core_type = #tpu.core_type<tc>} {
    %c0 = arith.constant 0 : index
    %c0_0 = arith.constant 0 : index
    %c0_1 = arith.constant 0 : index
    %0 = vector.load %arg0[%c0, %c0_0, %c0_1] : memref<2x2x128xf32, #tpu.memory_space<vmem>>, vector<1x2x128xf32>
    %1 = vector.shape_cast %0 : vector<1x2x128xf32> to vector<2x128xf32>
    %c1 = arith.constant 1 : index
    %c0_2 = arith.constant 0 : index
    %c0_3 = arith.constant 0 : index
    %2 = vector.load %arg0[%c1, %c0_2, %c0_3] : memref<2x2x128xf32, #tpu.memory_space<vmem>>, vector<1x2x128xf32>
    %3 = vector.shape_cast %2 : vector<1x2x128xf32> to vector<2x128xf32>
    %c0_4 = arith.constant 0 : index
    %c0_5 = arith.constant 0 : index
    %4 = vector.load %arg1[%c0_4, %c0_5] : memref<2x128xf32, #tpu.memory_space<vmem>>, vector<2x128xf32>
    %5 = tpu.concatenate %1, %3, %4 in 1 : vector<2x128xf32>, vector<2x128xf32>, vector<2x128xf32> -> vector<2x384xf32>
    %c0_6 = arith.constant 0 : index
    %c0_7 = arith.constant 0 : index
    %6 = vector.load %arg2[%c0_6, %c0_7] : memref<384x128xf32, #tpu.memory_space<vmem>>, vector<384x128xf32>
    %cst = arith.constant dense<0.000000e+00> : vector<2x128xf32>
    %7 = tpu.matmul %5, %6, %cst {dimension_numbers = #tpu.dot_dimension_numbers<[1], [0], [0], [1], [0, 0, 1, 1], [], []>} : vector<2x384xf32>, vector<384x128xf32>, vector<2x128xf32> -> vector<2x128xf32>
    %c0_8 = arith.constant 0 : index
    %c0_9 = arith.constant 0 : index
    %8 = vector.load %arg3[%c0_8, %c0_9] : memref<1x128xf32, #tpu.memory_space<vmem>>, vector<1x128xf32>
    %9 = vector.broadcast %8 : vector<1x128xf32> to vector<2x128xf32>
    %10 = arith.addf %7, %9 : vector<2x128xf32>
    %cst_10 = arith.constant 0.000000e+00 : f32
    %11 = vector.broadcast %cst_10 : f32 to vector<2x128xf32>
    %12 = arith.maximumf %10, %11 : vector<2x128xf32>
    %c0_11 = arith.constant 0 : index
    %c0_12 = arith.constant 0 : index
    %13 = vector.load %arg4[%c0_11, %c0_12] : memref<128x128xf32, #tpu.memory_space<vmem>>, vector<128x128xf32>
    %cst_13 = arith.constant dense<0.000000e+00> : vector<2x128xf32>
    %14 = tpu.matmul %12, %13, %cst_13 {dimension_numbers = #tpu.dot_dimension_numbers<[1], [0], [0], [1], [0, 0, 1, 1], [], []>} : vector<2x128xf32>, vector<128x128xf32>, vector<2x128xf32> -> vector<2x128xf32>
    %c0_14 = arith.constant 0 : index
    %c0_15 = arith.constant 0 : index
    %15 = vector.load %arg5[%c0_14, %c0_15] : memref<1x128xf32, #tpu.memory_space<vmem>>, vector<1x128xf32>
    %16 = vector.broadcast %15 : vector<1x128xf32> to vector<2x128xf32>
    %17 = arith.addf %14, %16 : vector<2x128xf32>
    %c0_16 = arith.constant 0 : index
    %c0_17 = arith.constant 0 : index
    %18 = vector.load %arg6[%c0_16, %c0_17] : memref<2x128xf32, #tpu.memory_space<vmem>>, vector<2x128xf32>
    tpu.vector_store %arg6[%c0_16, %c0_17], %17 {strides = array<i32>} : memref<2x128xf32, #tpu.memory_space<vmem>>, vector<2x128xf32>,
    return
  }
}

</mosaic_0001>

<bundles_post_ra>
// kernel: _gaze_forward_impl.3
= control target key start
LH: loop header
LB: loop body
LE: loop exit
PB: predicated region body
PF: predicated region fallthrough
CT: control target
= control target key end

     0   :  { %v582_v7 = vmov 0.0|0.0   ;;  %vm583_vm0 = vmmov 0   ;;  %v584_v8 = vmov 0.0   ;;  %s860_s0 = inlined_call_operand.vmem [shape: f32[2,2,128], index: 0, kind: input, shape index: {}]   ;;  %s861_s1 = inlined_call_operand.vmem [shape: f32[2,128], index: 1, kind: input, shape index: {}]   ;;  %s862_s2 = inlined_call_operand.vmem [shape: f32[384,128], index: 2, kind: input, shape index: {}]   ;;  %s863_s3 = inlined_call_operand.vmem [shape: f32[1,128], index: 3, kind: input, shape index: {}]   ;;  %s864_s4 = inlined_call_operand.vmem [shape: f32[128,128], index: 4, kind: input, shape index: {}]   ;;  %s865_s5 = inlined_call_operand.vmem [shape: f32[1,128], index: 5, kind: input, shape index: {}]   ;;  %s866_s6 = inlined_call_operand.hbm [shape: f32[2,128], index: 6, kind: output, shape index: {}]  }
   0x1   :  { %v44_v0 = vld [vmem:[%s862_s2 + $0x80] sm:$0xff]  ;;  %v45_v1 = vld [vmem:[%s862_s2 + $0x88] sm:$0xff]  ;;  %v46_v5 = vld [vmem:[%s862_s2 + $0x90] sm:$0xff]  ;;  %506 = vmatprep.subr.bf16.mxu1 %v582_v7  ;;  %436 = vmatprep.mubr.msk.f32.mxu1 %vm583_vm0, %v584_v8 }
   0x2   :  { %v28_v2 = vld [vmem:[%s862_s2] sm:$0xff]  ;;  %v474_v3 = vpack.c.bf16 %v45_v1, %v44_v0  ;;  %v29_v4 = vld [vmem:[%s862_s2 + $0x8] sm:$0xff]  ;;  %v47_v6 = vld [vmem:[%s862_s2 + $0x98] sm:$0xff] }
   0x3   :  { %v476_v9 = vpack.c.bf16 %v29_v4, %v28_v2  ;;  %v478_v10 = vpack.c.bf16 %v47_v6, %v46_v5  ;;  %v30_v11 = vld [vmem:[%s862_s2 + $0x10] sm:$0xff]  ;;  %v31_v12 = vld [vmem:[%s862_s2 + $0x18] sm:$0xff]  ;;  %v60_v13 = vld [vmem:[%s862_s2 + $0x100] sm:$0xff] }
   0x4   :  { %475 = vmatprep.subr.bf16.mxu0 %v474_v3  ;;  %v61_v14 = vld [vmem:[%s862_s2 + $0x108] sm:$0xff]  ;;  %v48_v15 = vld [vmem:[%s862_s2 + $0xa0] sm:$0xff]  ;;  %v480_v17 = vpack.c.bf16 %v31_v12, %v30_v11  ;;  %v62_v19 = vld [vmem:[%s862_s2 + $0x110] sm:$0xff] }
   0x5   :  { %v49_v16 = vld [vmem:[%s862_s2 + $0xa8] sm:$0xff]  ;;  %477 = vmatpush3.bf16.msra.mxu0 %v476_v9  ;;  %v507_v18 = vpack.c.bf16 %v61_v14, %v60_v13  ;;  %v32_v21 = vld [vmem:[%s862_s2 + $0x20] sm:$0xff]  ;;  %v63_v23 = vld [vmem:[%s862_s2 + $0x118] sm:$0xff] }
   0x6   :  { %479 = vmatprep.subr.bf16.mxu0 %v478_v10  ;;  %v482_v20 = vpack.c.bf16 %v49_v16, %v48_v15  ;;  %v33_v22 = vld [vmem:[%s862_s2 + $0x28] sm:$0xff]  ;;  %v510_v24 = vpack.c.bf16 %v63_v23, %v62_v19  ;;  %v50_v25 = vld [vmem:[%s862_s2 + $0xb0] sm:$0xff]  ;;  %v51_v26 = vld [vmem:[%s862_s2 + $0xb8] sm:$0xff] }
   0x7   :  { %508 = vmatpush3.bf16.msra.mxu1 %v507_v18  ;;  %v64_v27 = vld [vmem:[%s862_s2 + $0x120] sm:$0xff]  ;;  %v65_v28 = vld [vmem:[%s862_s2 + $0x128] sm:$0xff]  ;;  %v484_v29 = vpack.c.bf16 %v33_v22, %v32_v21  ;;  %v486_v30 = vpack.c.bf16 %v51_v26, %v50_v25  ;;  %v34_v31 = vld [vmem:[%s862_s2 + $0x30] sm:$0xff] }
   0x8   :  { %509 = vmatprep.subr.bf16.mxu1 %v582_v7  ;;  %v35_v32 = vld [vmem:[%s862_s2 + $0x38] sm:$0xff]  ;;  %v513_v33 = vpack.c.bf16 %v65_v28, %v64_v27  ;;  %v52_v34 = vld [vmem:[%s862_s2 + $0xc0] sm:$0xff]  ;;  %v53_v35 = vld [vmem:[%s862_s2 + $0xc8] sm:$0xff] }
   0x9   :  { %481 = vmatpush3.bf16.msra.mxu0 %v480_v17  ;;  %v66_v36 = vld [vmem:[%s862_s2 + $0x130] sm:$0xff]  ;;  %v67_v37 = vld [vmem:[%s862_s2 + $0x138] sm:$0xff]  ;;  %v488_v38 = vpack.c.bf16 %v35_v32, %v34_v31  ;;  %v490_v39 = vpack.c.bf16 %v53_v35, %v52_v34  ;;  %v36_v40 = vld [vmem:[%s862_s2 + $0x40] sm:$0xff] }
   0xa   :  { %483 = vmatprep.subr.bf16.mxu0 %v482_v20  ;;  %v37_v41 = vld [vmem:[%s862_s2 + $0x48] sm:$0xff]  ;;  %v516_v42 = vpack.c.bf16 %v67_v37, %v66_v36  ;;  %v54_v43 = vld [vmem:[%s862_s2 + $0xd0] sm:$0xff]  ;;  %v55_v44 = vld [vmem:[%s862_s2 + $0xd8] sm:$0xff] }
   0xb   :  { %511 = vmatpush3.bf16.msra.mxu1 %v510_v24  ;;  %v68_v45 = vld [vmem:[%s862_s2 + $0x140] sm:$0xff]  ;;  %v69_v46 = vld [vmem:[%s862_s2 + $0x148] sm:$0xff]  ;;  %v492_v48 = vpack.c.bf16 %v37_v41, %v36_v40  ;;  %v494_v49 = vpack.c.bf16 %v55_v44, %v54_v43  ;;  %v38_v50 = vld [vmem:[%s862_s2 + $0x50] sm:$0xff] }
   0xc   :  { %512 = vmatprep.subr.bf16.mxu1 %v582_v7  ;;  %v332_v47 = vld [vmem:[%s860_s0 + $0x2] sm:$0x3]  ;;  %v39_v51 = vld [vmem:[%s862_s2 + $0x58] sm:$0xff]  ;;  %v519_v52 = vpack.c.bf16 %v69_v46, %v68_v45  ;;  %v57_v54 = vld [vmem:[%s862_s2 + $0xe8] sm:$0xff] }
   0xd   :  { %485 = vmatpush3.bf16.msra.mxu0 %v484_v29  ;;  %147 = vmatprep.mubr.f32.mxu0 %v332_v47  ;;  %v56_v53 = vld [vmem:[%s862_s2 + $0xe0] sm:$0xff]  ;;  %v70_v55 = vld [vmem:[%s862_s2 + $0x150] sm:$0xff]  ;;  %v71_v56 = vld [vmem:[%s862_s2 + $0x158] sm:$0xff]  ;;  %v496_v57 = vpack.c.bf16 %v39_v51, %v38_v50 }
   0xe   :  { %487 = vmatprep.subr.bf16.mxu0 %v486_v30  ;;  %v498_v58 = vpack.c.bf16 %v57_v54, %v56_v53  ;;  %v40_v59 = vld [vmem:[%s862_s2 + $0x60] sm:$0xff]  ;;  %v41_v60 = vld [vmem:[%s862_s2 + $0x68] sm:$0xff] }
   0xf   :  { %514 = vmatpush3.bf16.msra.mxu1 %v513_v33 }
  0x10   :  { %515 = vmatprep.subr.bf16.mxu1 %v582_v7 }
  0x11   :  { %489 = vmatpush3.bf16.msra.mxu0 %v488_v38 }
  0x12   :  { %491 = vmatprep.subr.bf16.mxu0 %v490_v39 }
  0x13   :  { %517 = vmatpush3.bf16.msra.mxu1 %v516_v42 }
  0x14   :  { %518 = vmatprep.subr.bf16.mxu1 %v582_v7 }
  0x15   :  { %493 = vmatpush3.bf16.msra.mxu0 %v492_v48 }
  0x16   :  { %495 = vmatprep.subr.bf16.mxu0 %v494_v49 }
  0x17   :  { %11 = vsyncpa [#allocation3], 0  ;;  %520 = vmatpush3.bf16.msra.mxu1 %v519_v52  ;;  %v522_v61 = vpack.c.bf16 %v71_v56, %v70_v55  ;;  %v58_v62 = vld [vmem:[%s862_s2 + $0xf0] sm:$0xff]  ;;  %v59_v63 = vld [vmem:[%s862_s2 + $0xf8] sm:$0xff]  ;;  %v500_v2 = vpack.c.bf16 %v41_v60, %v40_v59 }
  0x18   :  { %521 = vmatprep.subr.bf16.mxu1 %v582_v7  ;;  %v72_v0 = vld [vmem:[%s862_s2 + $0x160] sm:$0xff]  ;;  %v73_v1 = vld [vmem:[%s862_s2 + $0x168] sm:$0xff]  ;;  %v502_v3 = vpack.c.bf16 %v59_v63, %v58_v62  ;;  %v42_v4 = vld [vmem:[%s862_s2 + $0x70] sm:$0xff] }
  0x19   :  { %497 = vmatpush3.bf16.msra.mxu0 %v496_v57  ;;  %v43_v5 = vld [vmem:[%s862_s2 + $0x78] sm:$0xff]  ;;  %v525_v6 = vpack.c.bf16 %v73_v1, %v72_v0  ;;  %v74_v9 = vld [vmem:[%s862_s2 + $0x170] sm:$0xff]  ;;  %v224_v12 = vld [vmem:[%s864_s4] sm:$0xff] }
  0x1a   :  { %499 = vmatprep.subr.bf16.mxu0 %v498_v58  ;;  %v75_v10 = vld [vmem:[%s862_s2 + $0x178] sm:$0xff]  ;;  %v504_v11 = vpack.c.bf16 %v43_v5, %v42_v4  ;;  %v225_v13 = vld [vmem:[%s864_s4 + $0x8] sm:$0xff]  ;;  %v24_v15 = vld [vmem:[%s860_s0] sm:$0x3] }
  0x1b   :  { %523 = vmatpush3.bf16.msra.mxu1 %v522_v61  ;;  %v528_v14 = vpack.c.bf16 %v75_v10, %v74_v9  ;;  %v531_v16 = vpack.c.bf16 %v225_v13, %v224_v12  ;;  %v226_v17 = vld [vmem:[%s864_s4 + $0x10] sm:$0xff]  ;;  %v227_v18 = vld [vmem:[%s864_s4 + $0x18] sm:$0xff]  ;;  %v27_v19 = vld [vmem:[%s861_s1] sm:$0x3] }
  0x1c   :  { %524 = vmatprep.subr.bf16.mxu1 %v582_v7  ;;  %v534_v20 = vpack.c.bf16 %v227_v18, %v226_v17  ;;  %v228_v21 = vld [vmem:[%s864_s4 + $0x20] sm:$0xff]  ;;  %v229_v22 = vld [vmem:[%s864_s4 + $0x28] sm:$0xff]  ;;  %v230_v24 = vld [vmem:[%s864_s4 + $0x30] sm:$0xff] }
  0x1d   :  { %501 = vmatpush3.bf16.msra.mxu0 %v500_v2  ;;  %v537_v23 = vpack.c.bf16 %v229_v22, %v228_v21  ;;  %v232_v26 = vld [vmem:[%s864_s4 + $0x40] sm:$0xff]  ;;  %v233_v27 = vld [vmem:[%s864_s4 + $0x48] sm:$0xff]  ;;  %v234_v29 = vld [vmem:[%s864_s4 + $0x50] sm:$0xff] }
  0x1e   :  { %503 = vmatprep.subr.bf16.mxu0 %v502_v3  ;;  %v543_v28 = vpack.c.bf16 %v233_v27, %v232_v26  ;;  %v235_v30 = vld [vmem:[%s864_s4 + $0x58] sm:$0xff]  ;;  %v236_v32 = vld [vmem:[%s864_s4 + $0x60] sm:$0xff]  ;;  %v237_v33 = vld [vmem:[%s864_s4 + $0x68] sm:$0xff] }
  0x1f   :  { %526 = vmatpush3.bf16.msra.mxu1 %v525_v6  ;;  %v546_v31 = vpack.c.bf16 %v235_v30, %v234_v29  ;;  %v549_v34 = vpack.c.bf16 %v237_v33, %v236_v32  ;;  %v238_v35 = vld [vmem:[%s864_s4 + $0x70] sm:$0xff]  ;;  %v239_v36 = vld [vmem:[%s864_s4 + $0x78] sm:$0xff]  ;;  %v333_v40 = vld [vmem:[%s863_s3] ss:$0 sm:$0xff] }
  0x20   :  { %527 = vmatprep.subr.bf16.mxu1 %v582_v7  ;;  %v552_v37 = vpack.c.bf16 %v239_v36, %v238_v35  ;;  %v334_v46 = vld [vmem:[%s865_s5] ss:$0 sm:$0xff] }
  0x21   :  { %505 = vmatpush3.bf16.msra.mxu0 %v504_v11 }
  0x22   :  { %530 = vmatprep.subr.bf16.mxu0 %v582_v7 }
  0x23   :  { %529 = vmatpush3.bf16.msra.mxu1 %v528_v14 }
  0x24   :  { %148 = vmatmul.mubr.f32.vlgmr.msra.gmra.mrb[0].mxu0 %v24_v15 }
  0x25   :  { %532 = vmatpush3.bf16.msra.mxu0 %v531_v16  ;;  %471 = vmatprep.mubr.msk.f32.mxu0 %vm583_vm0, %v584_v8  ;;  %v231_v8 = vld [vmem:[%s864_s4 + $0x38] sm:$0xff]  ;;  %s585_s4 = smov [#allocation2]  }
  0x26   :  { %437 = vmatmul.mubr.f32.vlgmr.msra.gmra.mrb[0].mxu1 %v27_v19  ;;  %533 = vmatprep.subr.bf16.mxu0 %v582_v7  ;;  %v540_v25 = vpack.c.bf16 %v231_v8, %v230_v24  ;;  %s324_s10 = sshll.u32 %s585_s4, 4  ;;  %s325_s10 = int_to_ptr.vmem [resolvable:$true] %s324_s10 }
  0x27   :  { %s558_s11 = scalar_lea.vmem %s325_s10, 32  ;;  %p563_p1 = scmp.lt.s32.totalorder %s325_s10, %s325_s10 }
  0x28   :  { %p559_p0 = scmp.ne.s32.totalorder %s325_s10, %s558_s11  ;;  %p564_p2 = scmp.lt.s32.totalorder %s558_s11, %s558_s11 }
  0x29   :  { %535 = vmatpush3.bf16.msra.mxu0 %v534_v20 }
  0x2a   :  { %536 = vmatprep.subr.bf16.mxu0 %v582_v7  ;;  %p565_p3 = por %p564_p2, %p563_p1 }
  0x2c   :  { %p566_p4 = pnand %p565_p3, %p559_p0 }
  0x2d   :  { %538 = vmatpush3.bf16.msra.mxu0 %v537_v23 }
  0x2e   :  { %539 = vmatprep.subr.bf16.mxu0 %v582_v7 }
  0x31   :  { %541 = vmatpush3.bf16.msra.mxu0 %v540_v25 }
  0x32   :  { %542 = vmatprep.subr.bf16.mxu0 %v582_v7 }
  0x35   :  { %544 = vmatpush3.bf16.msra.mxu0 %v543_v28 }
  0x36   :  { %545 = vmatprep.subr.bf16.mxu0 %v582_v7 }
  0x39   :  { %547 = vmatpush3.bf16.msra.mxu0 %v546_v31 }
  0x3a   :  { %548 = vmatprep.subr.bf16.mxu0 %v582_v7 }
  0x3d   :  { %550 = vmatpush3.bf16.msra.mxu0 %v549_v34 }
  0x3e   :  { %551 = vmatprep.subr.bf16.mxu0 %v582_v7 }
  0x41   :  { %553 = vmatpush3.bf16.msra.mxu0 %v552_v37 }
  0xf7   :  { %v367_v38 = vpop.f32.mrb[0].mxu0 }
  0xf8   :  { %v368_v39 = vpop.f32.mrb[1].mxu0 }
  0xf9   :  { %v369_v41 = vadd.f32 %v368_v39, %v367_v38  ;;  %v219_v42 = vpop.f32.mrb[0].mxu1 }
  0xfa   :  { %v438_v43 = vpop.f32.mrb[1].mxu1 }
  0xfb   :  { %v150_v7 = vadd.f32 %v369_v41, %v333_v40 }
  0xfd   :  { %v220_v44 = vadd.f32 %v219_v42, %v150_v7 }
  0xff   :  { %v223_v45 = vmax.f32 %v220_v44, 0.0 }
 0x101   :  { %472 = vmatmul.mubr.f32.vlgmr.msra.gmra.mrb[2].mxu0 %v223_v45 }
 0x1d4   :  { %v313_v47 = vpop.f32.mrb[2].mxu0 }
 0x1d5   :  { %v314_v48 = vadd.f32 %v334_v46, %v313_v47  ;;  %v473_v49 = vpop.f32.mrb[3].mxu0 }
 0x1d7   :  { %317 = vst [vmem:[#allocation2] sm:$0x3] %v314_v48 }
 0x1d8   :  { %569 = shalt.err (!%p566_p4)
}
 0x1d9   :  { %s570_s1 = scalar_lea.hbm %s866_s6, 32 }
 0x1da   :  { %p571_p5 = scmp.ne.s32.totalorder %s866_s6, %s570_s1  ;;  %p574_p6 = scmp.lt.u32.totalorder %s570_s1, %s866_s6 }
 0x1dc   :  { %p576_p7 = pnand %p574_p6, %p571_p5 }
 0x1de   :  { %579 = shalt.err (!%p576_p7)
}
 0x1df   :  { %327 = dma.vmem_to_hbm [thread:$0]  %s325_s10, 32, %s866_s6, [#allocation3]  }
 0x1e0   :  { %580 = dma.done.wait [#allocation3], 32  }
 0x1e1   :  { %581 = vsyncadd [#allocation3], 4294967264 }
 0x1e2   :  { %331 = vsyncpa [#allocation3], 1 }

// kernel: _gaze_forward_impl.2
= control target key start
LH: loop header
LB: loop body
LE: loop exit
PB: predicated region body
PF: predicated region fallthrough
CT: control target
= control target key end

     0   :  { %s837_s12 = smov 0   ;;  %s839_s13 = smov 0   ;;  %s948_s0 = inlined_call_operand.vmem [shape: bf16[2,2,256,32], index: 0, kind: input, shape index: {}]   ;;  %s949_s1 = inlined_call_operand.vmem [shape: bf16[32,128], index: 1, kind: input, shape index: {}]   ;;  %s950_s2 = inlined_call_operand.vmem [shape: f32[1,128], index: 2, kind: input, shape index: {}]   ;;  %s951_s3 = inlined_call_operand.vmem [shape: f32[2,2,128], index: 3, kind: output, shape index: {}]  }
   0x1   :  { %s841_s14 = smov 0   ;;  %s843_s15 = smov 0  }
   0x2   :  { %s845_s16 = smov 0   ;;  %s847_s17 = smov 0  }
   0x3   :  { %s849_s18 = smov 0  }
   0x4 LB: > { %s22_s19 = sadd.s32 1, %s806_s16  ;;  %s25_s20 = sadd.s32 1, %s810_s17  ;;  %s814_s18 = sphi %s849_s18, %s13_s18   ;;  %s810_s17 = sphi %s847_s17, %s957_s17   ;;  %s806_s16 = sphi %s845_s16, %s956_s16   ;;  %s802_s15 = sphi %s843_s15, %s955_s15   ;;  %s798_s14 = sphi %s841_s14, %s954_s14   ;;  %s794_s13 = sphi %s839_s13, %s953_s13   ;;  %s790_s12 = sphi %s837_s12, %s952_s12  }
   0x5   : > { %p23_p0 = scmp.ge.s32.totalorder %s22_s19, 4  ;;  %p41_p1 = scmp.ne.s32.totalorder %s794_s13, %s790_s12 }
   0x6   : > { %p42_p2 = scmp.eq.s32.totalorder %s814_s18, 0  ;;  %s34_s24 = sadd.s32 1, %s794_s13 }
   0x7   : > { %s959_s19 = smov (%p23_p0, %s22_s19), 0  ;;  %s961_s20 = smov (!%p23_p0, %s25_s20), %s810_s17 }
   0x8   : > { %p43_p3 = por %p42_p2, %p41_p1  ;;  %p27_p4 = scmp.ge.s32.totalorder %s961_s20, 2 }
   0x9   : > { %s30_s21 = ssub.s32 %s806_s16, %s959_s19  ;;  %p628_p6 = scmp.ge.s32.totalorder %s814_s18, 8 }
   0xa   : > { %s963_s20 = smov (%p27_p4, %s961_s20), 0 }
   0xb   : > { %s29_s22 = ssub.s32 %s810_s17, %s963_s20  ;;  %141 = sbr.rel (%p628_p6) target bundleno = 29 (0x1d), region = 24 }
   0xc   : > { %s31_s23 = sor.u32 %s30_s21, %s29_s22 }
   0xd   : > { %p32_p5 = scmp.eq.s32.totalorder %s31_s23, 0 }
   0xf   : > { %s888_s25 = scalar_select %p32_p5, %s794_s13, %s34_s24  }
  0x12   : > { %144 = sbr.rel (!%p43_p3) target bundleno = 29 (0x1d), region = 28  ;;  %s146_s26 = sand.u32 (%p43_p3), 1, %s794_s13  }
  0x13   : > { %s630_s27 = sshll.u32 (%p43_p3), %s806_s16, 3  ;;  %s629_s28 = sshll.u32 (%p43_p3), %s146_s26, 6 }
  0x14   : > { %s631_s29 = sshll.u32 (%p43_p3), %s810_s17, 6  ;;  %s148_s8 = scalar_lea.vmem (%p43_p3), [#allocation3], %s629_s28 }
  0x15   : > { %s151_s30 = sadd.s32 (%p43_p3), %s631_s29, %s630_s27 }
  0x16   : > { %s632_s4 = sshll.u32 (%p43_p3), %s151_s30, 2 }
  0x17   : > { %s153_s7 = scalar_lea.vmem (%p43_p3), %s948_s0, %s632_s4 }
  0x18   : > { %v169_v0 = vld [vmem:[%s153_s7] sm:$0xff] (%p43_p3)   ;;  %v173_v1 = vld [vmem:[%s153_s7 + $0x8] sm:$0xff] (%p43_p3)   ;;  %v177_v2 = vld [vmem:[%s153_s7 + $0x10] sm:$0xff] (%p43_p3)  }
  0x19   : > { %170 = vst [vmem:[%s148_s8] sm:$0xff] %v169_v0   ;;  %174 = vst [vmem:[%s148_s8 + $0x8] sm:$0xff] %v173_v1   ;;  %v181_v3 = vld [vmem:[%s153_s7 + $0x18] sm:$0xff]   ;;  %v185_v4 = vld [vmem:[%s153_s7 + $0x80] sm:$0xff]  }
  0x1a   : > { %178 = vst [vmem:[%s148_s8 + $0x10] sm:$0xff] %v177_v2   ;;  %v189_v5 = vld [vmem:[%s153_s7 + $0x88] sm:$0xff]   ;;  %182 = vst [vmem:[%s148_s8 + $0x18] sm:$0xff] %v181_v3   ;;  %v193_v6 = vld [vmem:[%s153_s7 + $0x90] sm:$0xff]  }
  0x1b   : > { %186 = vst [vmem:[%s148_s8 + $0x20] sm:$0xff] %v185_v4   ;;  %190 = vst [vmem:[%s148_s8 + $0x28] sm:$0xff] %v189_v5   ;;  %v197_v7 = vld [vmem:[%s153_s7 + $0x98] sm:$0xff]  }
  0x1c   : > { %194 = vst [vmem:[%s148_s8 + $0x30] sm:$0xff] %v193_v6   ;;  %198 = vst [vmem:[%s148_s8 + $0x38] sm:$0xff] %v197_v7  }
  0x1d PF: > { %p633_p7 = scmp.ge.s32.totalorder %s814_s18, 1  ;;  %p254_p8 = scmp.lt.s32.totalorder %s814_s18, 9 }
  0x1f   : > { %p255_p9 = pnand %p633_p7, %p254_p8 }
  0x20   : > { %s261_s9 = sand.u32 (!%p255_p9), 1, %s790_s12   ;;  %p284_p10 = scmp.lt.s32.totalorder (!%p255_p9), %s802_s15, 1 }
  0x21   : > { %258 = sbr.rel (%p255_p9) target bundleno = 316 (0x13c), region = 69  ;;  %s634_s10 = sshll.u32 (!%p255_p9), %s261_s9, 6 }
  0x22   : > { %s263_s24 = scalar_lea.vmem (!%p255_p9), [#allocation3], %s634_s10  ;;  %p636_p11 = scmp.ne.s32.totalorder (!%p255_p9), %s798_s14, 0 }
  0x28   : > { %s965_s15 = smov (!%p284_p10, %s802_s15), 1  ;;  %292 = sbr.rel (%p636_p11) target bundleno = 47 (0x2f), region = 77 }
  0x29   : > { %s635_s11 = sshll.u32 %s965_s15, 1  ;;  %v816_v8 = vmov (!%p636_p11), 0.0  }
  0x2a   : > { %s905_s23 = scalar_lea.vmem %s951_s3, %s635_s11  ;;  %293 = vst [vmem:[#allocation2] sm:$0x3] (!%p636_p11), %v816_v8 }
  0x2f PF: > { %v750_v9 = vld [vmem:[%s949_s1] sm:$0xff]   ;;  %v751_v10 = vld [vmem:[%s949_s1 + $0x8] sm:$0xff]   ;;  %vm373_vm0 = vcmask 261120   ;;  %v756_v15 = vld [vmem:[%s263_s24 + $0x10] sm:$0xff]   ;;  %vm540_vm1 = vcmask 1041409   ;;  %p656_p12 = scmp.ne.s32.totalorder %s798_s14, 3 }
  0x30   : > { %669 = vmatprep.subr.bf16.mxu0 %v750_v9  ;;  %689 = vmatprep.subr.bf16.mxu1 %v750_v9  ;;  %v752_v11 = vld [vmem:[%s263_s24] sm:$0xff]   ;;  %v754_v13 = vld [vmem:[%s263_s24 + $0x8] sm:$0xff]   ;;  %v757_v16 = vld [vmem:[%s263_s24 + $0x30] sm:$0xff]  }
  0x31   : > { %670 = vmatpush3.bf16.msra.mxu0 %v750_v9  ;;  %691 = vmatpush3.bf16.msra.mxu1 %v750_v9  ;;  %v753_v12 = vld [vmem:[%s263_s24 + $0x20] sm:$0xff]   ;;  %v755_v14 = vld [vmem:[%s263_s24 + $0x28] sm:$0xff]   ;;  %v758_v17 = vld [vmem:[%s263_s24 + $0x18] sm:$0xff]  }
  0x32   : > { %671 = vmatprep.subr.bf16.mxu0 %v751_v10  ;;  %690 = vmatprep.subr.bf16.mxu1 %v751_v10  ;;  %v759_v18 = vld [vmem:[%s263_s24 + $0x38] sm:$0xff]  }
  0x33   : > { %673 = vmatprep.mubr.msk.bf16.mxu0 %vm373_vm0, %v752_v11  ;;  %681 = vmatprep.mubr.msk.bf16.mxu1 %vm373_vm0, %v753_v12  ;;  %v637_v19 = vld [vmem:[%s950_s2] ss:$0 sm:$0xff] }
  0x35   : > { %672 = vmatpush3.bf16.msra.mxu0 %v751_v10  ;;  %692 = vmatpush3.bf16.msra.mxu1 %v751_v10 }
  0x38   : > { %674 = vmatmul.mubr.msk.bf16.vlgmr.msra.gmra.mrb[0].mxu0 %vm373_vm0, %v754_v13  ;;  %682 = vmatmul.mubr.msk.bf16.vlgmr.msra.gmra.mrb[0].mxu1 %vm373_vm0, %v755_v14 }
  0x39   : > { %677 = vmatprep.mubr.msk.bf16.mxu0 %vm373_vm0, %v756_v15  ;;  %685 = vmatprep.mubr.msk.bf16.mxu1 %vm373_vm0, %v757_v16 }
  0x40   : > { %678 = vmatmul.mubr.msk.bf16.gmra.mrb[4].mxu0 %vm373_vm0, %v758_v17  ;;  %686 = vmatmul.mubr.msk.bf16.gmra.mrb[4].mxu1 %vm373_vm0, %v759_v18 }
 0x10b   : > { %v675_v20 = vpop.f32.mrb[0].mxu0  ;;  %v683_v21 = vpop.f32.mrb[0].mxu1 }
 0x10c   : > { %v432_v22 = vpop.f32.mrb[1].mxu0  ;;  %v464_v23 = vpop.f32.mrb[1].mxu1  ;;  %v441_v30 = vadd.f32 %v675_v20, %v637_v19  ;;  %v473_v31 = vadd.f32 %v683_v21, %v637_v19 }
 0x10d   : > { %v433_v24 = vadd.f32 %v637_v19, %v432_v22  ;;  %v465_v25 = vadd.f32 %v637_v19, %v464_v23  ;;  %v676_v26 = vpop.f32.mrb[2].mxu0  ;;  %v684_v27 = vpop.f32.mrb[2].mxu1 }
 0x10e   : > { %v435_v28 = vpop.f32.mrb[3].mxu0  ;;  %v467_v29 = vpop.f32.mrb[3].mxu1  ;;  %v444_v34 = vadd.f32 %v676_v26, %v637_v19  ;;  %v476_v35 = vadd.f32 %v684_v27, %v637_v19  ;;  %v497_v40 = vmax.f32 %v441_v30, 0.0  ;;  %v505_v41 = vmax.f32 %v473_v31, 0.0 }
 0x10f   : > { %v436_v32 = vadd.f32 %v637_v19, %v435_v28  ;;  %v468_v33 = vadd.f32 %v637_v19, %v467_v29  ;;  %v495_v36 = vmax.f32 %v433_v24, 0.0  ;;  %v503_v37 = vmax.f32 %v465_v25, 0.0  ;;  %v511_v29 = vld [vmem:[#allocation2] sm:$0x3] }
 0x110   : > { %v498_v46 = vmax.f32 %v444_v34, 0.0  ;;  %v506_v47 = vmax.f32 %v476_v35, 0.0 }
 0x111   : > { %v496_v38 = vmax.f32 %v436_v32, 0.0  ;;  %v504_v39 = vmax.f32 %v468_v33, 0.0 }
 0x113   : > { %v512_v42 = vadd.f32 %v496_v38, %v495_v36  ;;  %v525_v43 = vadd.f32 %v504_v39, %v503_v37  ;;  %v679_v44 = vpop.f32.mrb[4].mxu0  ;;  %v687_v45 = vpop.f32.mrb[4].mxu1 }
 0x114   : > { %v448_v48 = vpop.f32.mrb[5].mxu0  ;;  %v480_v49 = vpop.f32.mrb[5].mxu1  ;;  %v457_v62 = vadd.f32 %v679_v44, %v637_v19  ;;  %v489_v63 = vadd.f32 %v687_v45, %v637_v19 }
 0x115   : > { %v513_v50 = vadd.f32 %v512_v42, %v497_v40  ;;  %v526_v51 = vadd.f32 %v525_v43, %v505_v41  ;;  %v449_v52 = vadd.f32 %v637_v19, %v448_v48  ;;  %v481_v53 = vadd.f32 %v637_v19, %v480_v49  ;;  %v680_v54 = vpop.f32.mrb[6].mxu0  ;;  %v688_v55 = vpop.f32.mrb[6].mxu1 }
 0x116   : > { %v451_v56 = vpop.f32.mrb[7].mxu0  ;;  %v483_v57 = vpop.f32.mrb[7].mxu1  ;;  %v460_v4 = vadd.f32 %v680_v54, %v637_v19  ;;  %v492_v5 = vadd.f32 %v688_v55, %v637_v19  ;;  %v501_v8 = vmax.f32 %v457_v62, 0.0  ;;  %v509_v9 = vmax.f32 %v489_v63, 0.0 }
 0x117   : > { %v499_v58 = vmax.f32 %v449_v52, 0.0  ;;  %v514_v59 = vadd.f32 %v513_v50, %v498_v46  ;;  %v507_v60 = vmax.f32 %v481_v53, 0.0  ;;  %v527_v61 = vadd.f32 %v526_v51, %v506_v47 }
 0x118   : > { %v452_v0 = vadd.f32 %v637_v19, %v451_v56  ;;  %v484_v1 = vadd.f32 %v637_v19, %v483_v57  ;;  %v502_v12 = vmax.f32 %v460_v4, 0.0  ;;  %v510_v13 = vmax.f32 %v492_v5, 0.0 }
 0x119   : > { %v515_v2 = vadd.f32 %v514_v59, %v499_v58  ;;  %v528_v3 = vadd.f32 %v527_v61, %v507_v60 }
 0x11a   : > { %v500_v6 = vmax.f32 %v452_v0, 0.0  ;;  %v508_v7 = vmax.f32 %v484_v1, 0.0 }
 0x11c   : > { %v516_v10 = vadd.f32 %v515_v2, %v500_v6  ;;  %v529_v11 = vadd.f32 %v528_v3, %v508_v7 }
 0x11e   : > { %v517_v14 = vadd.f32 %v516_v10, %v501_v8  ;;  %v530_v15 = vadd.f32 %v529_v11, %v509_v9 }
 0x120   : > { %v518_v16 = vadd.f32 %v517_v14, %v502_v12  ;;  %v531_v17 = vadd.f32 %v530_v15, %v510_v13 }
 0x122   : > { %v519_v18 = vrot.slane %v518_v16, 4  ;;  %v532_v20 = vrot.slane %v531_v17, 4 }
 0x124   : > { %v520_v21 = vadd.f32 %v519_v18, %v518_v16  ;;  %v533_v22 = vadd.f32 %v532_v20, %v531_v17 }
 0x126   : > { %v521_v23 = vrot.slane %v520_v21, 2  ;;  %v534_v24 = vrot.slane %v533_v22, 2 }
 0x128   : > { %v522_v25 = vadd.f32 %v521_v23, %v520_v21  ;;  %v535_v19 = vadd.f32 %v534_v24, %v533_v22 }
 0x12a   : > { %v523_v26 = vrot.slane %v522_v25, 1  ;;  %v536_v27 = vrot.slane %v535_v19, 1 }
 0x12b   : > { %548 = sbr.rel (%p656_p12) target bundleno = 316 (0x13c), region = 81 }
 0x12c   : > { %v524_v28 = vadd.f32 %v523_v26, %v522_v25  ;;  %v537_v30 = vadd.f32 %v536_v27, %v535_v19 }
 0x12e   : > { %v541_v31 = vsel %vm540_vm1, %v537_v30, %v524_v28 }
 0x12f   : > { %v543_v32 = vadd.f32 %v541_v31, %v511_v29 }
 0x131   : > { %544 = vst [vmem:[#allocation2] sm:$0x3] %v543_v32 }
 0x138   : > { %v549_v33 = vld [vmem:[#allocation2] sm:$0x3] }
 0x139   : > { %v550_v34 = vmul.f32 0.00390625, %v549_v33 }
 0x13b   : > { %551 = vst [vmem:[%s905_s23] sm:$0x3] %v550_v34 }
 0x13c PF: > { %s13_s18 = sadd.s32 1, %s814_s18   ;;  %s952_s12 = smov %s794_s13 }
 0x13d   : > { %p10_p13 = scmp.ge.s32.totalorder %s13_s18, 10   ;;  %s953_s13 = smov %s888_s25 }
 0x13e   : > { %s954_s14 = smov %s806_s16  ;;  %s955_s15 = smov %s810_s17 }
 0x13f   : > { %s956_s16 = smov %s959_s19  ;;  %s957_s17 = smov %s963_s20 }
 0x140   :  { %12 = sbr.rel (!%p10_p13) target bundleno = 4 (0x4), region = 116 }

</bundles_post_ra>
